<compile_context>
chip_gen: v7x
topology: tpu7x:2x2x1
jax: 0.10.0
libtpu: 0.0.40
codegen_flags: <defaults>
</compile_context>

<pallas_src>
import math

import jax
import jax.numpy as jnp
from jax.experimental import pallas as pl
from jax.experimental.pallas import tpu as pltpu


# ----------------------------- Pallas kernel ---------------------------------

def _make_randgaus_kernel(compute_dtype):
    """Kernel factory so the (optional) packed-bf16 sin path is a closure constant."""

    def _randgaus_kernel(x_ref, w2_ref, o_ref):
        """One row-tile of the fully folded RandGaus positional encoding.

        x_ref  : (TN, K)       float32   VMEM   (K = coord_dim + 1; last col is ones)
        w2_ref : (K, pe_dim)   float32   VMEM   (resident; constant block index)
        o_ref  : (TN, pe_dim)  out dtype VMEM

        out = sin(x @ W2)  ==  [sin(omega*c@W + b), cos(omega*c@W + b)]
        (MXU does the tiny K<=4 matmul for free; the VPU sin polynomial over dense
         128-lane vregs is the binding slot.)
        """
        z = jnp.dot(x_ref[...], w2_ref[...], preferred_element_type=jnp.float32)
        if compute_dtype != jnp.float32:
            z = z.astype(compute_dtype)   # packed bf16 sin on v6e/v7x (opt-in)
        o_ref[...] = jnp.sin(z).astype(o_ref.dtype)

    return _randgaus_kernel


def _round_up(x, m):
    return ((x + m - 1) // m) * m


def _choose_tile(n_rows, row_tile, min_grid=2):
    """Pick a row tile: multiple of 8, <= N rounded up, and (for mid/large N)
    small enough that the grid keeps >= min_grid steps for v7x megacore sharding."""
    tile = _round_up(max(8, row_tile), 8)
    tile = min(tile, _round_up(n_rows, 8))
    if n_rows > 8 * min_grid:
        tile = min(tile, _round_up(pl.cdiv(n_rows, min_grid), 8))
    return max(8, tile)


def _default_out_dtype():
    """bf16 output on v5e (halves the co-binding HBM writeback); f32 elsewhere."""
    try:
        kind = jax.devices()[0].device_kind.lower()
    except Exception:
        return jnp.float32
    if ("v5e" in kind) or ("v5 lite" in kind) or ("v5lite" in kind):
        return jnp.bfloat16
    return jnp.float32


def randgaus_encode(coords_aug, W2, *, row_tile=4096, out_dtype=jnp.float32,
                    compute_dtype=jnp.float32):
    """coords_aug: (N, K) with a trailing ones column -> (N, pe_dim) via Pallas.

    row_tile: rows per grid step (multiple of 8). Default 4096 amortizes the
    ~0.35 µs per-step overhead; VMEM use is ~2 * row_tile * pe_dim * 4 B of output
    double-buffer plus a lane-padded input tile — a few MiB, safe on every generation
    (well under v7x's 64 MiB / 32 MiB scoped default).
    """
    N, K = coords_aug.shape
    pe_dim = W2.shape[1]
    assert W2.shape[0] == K

    tile = _choose_tile(N, row_tile)
    grid = (pl.cdiv(N, tile),)

    out_bytes = jnp.dtype(out_dtype).itemsize
    cost = pl.CostEstimate(
        flops=2 * N * K * pe_dim,
        transcendentals=N * pe_dim,
        bytes_accessed=N * (K * 4 + pe_dim * out_bytes) + K * pe_dim * 4,
    )

    # NOTE: pe_dim=128 keeps output stores lane-dense (unmasked vst). If pe_dim is
    # ever configured < 128, pad the kernel output to 128 lanes and slice in the wrapper.
    out = pl.pallas_call(
        _make_randgaus_kernel(compute_dtype),
        out_shape=jax.ShapeDtypeStruct((N, pe_dim), out_dtype),
        grid_spec=pltpu.PrefetchScalarGridSpec(
            num_scalar_prefetch=0,
            grid=grid,
            in_specs=[
                # coords row-tile (partial tail tile handled by masked DMA/store)
                pl.BlockSpec((tile, K), lambda i: (i, 0)),
                # folded weights (+bias row): constant block index -> fetched once,
                # stays resident across the whole grid.
                pl.BlockSpec((K, pe_dim), lambda i: (0, 0)),
            ],
            out_specs=pl.BlockSpec((tile, pe_dim), lambda i: (i, 0)),
        ),
        compiler_params=pltpu.CompilerParams(
            dimension_semantics=("parallel",)),
        cost_estimate=cost,
    )(coords_aug, W2)

    return out


# ------------------------------ Encoder wrapper -------------------------------

class Encoder:
    """JAX/Pallas port of wisp Encoder (positional_encoding path)."""

    def __init__(self, input_dim, encode_method, embedder_args, **kwargs):
        self.input_dim = input_dim
        self.encode_method = encode_method
        self.kwargs = kwargs
        if encode_method == "positional_encoding":
            # embedder_args ~ (dim, pe_dim, omega, sigma, pe_bias, seed, verbose)
            (dim, pe_dim, omega, sigma, pe_bias, seed, _verbose) = embedder_args
            assert dim == input_dim
            assert pe_dim % 2 == 0
            half = pe_dim // 2
            key = jax.random.PRNGKey(seed)
            kw, kb = jax.random.split(key)
            # Deterministic synthetic init: W ~ N(0, sigma^2)
            self.W = sigma * jax.random.normal(kw, (dim, half), dtype=jnp.float32)
            if pe_bias:
                self.b = 0.01 * jax.random.normal(kb, (1, half), dtype=jnp.float32)
            else:
                self.b = jnp.zeros((1, half), dtype=jnp.float32)
            self.omega = omega
            self.pe_dim = pe_dim
            # Fold omega, the sin/cos phase split AND the bias into one weight matrix:
            #   [x, 1] @ W2 = [omega*x@W + b, omega*x@W + b + pi/2]
            #   sin(.)      = [sin(z), cos(z)]
            w_body = omega * jnp.concatenate([self.W, self.W], axis=1)        # (dim, pe_dim)
            b_row = jnp.concatenate([self.b, self.b + (math.pi / 2.0)], axis=1)  # (1, pe_dim)
            self.W2 = jnp.concatenate([w_body, b_row], axis=0).astype(jnp.float32)  # (dim+1, pe_dim)
        elif encode_method == "grid":
            # TODO(synk): grid interpolation (OctreeGrid/HashGrid/...) not implemented.
            raise NotImplementedError("grid encode_method not supported in this port")

    def __call__(self, coords, lod_idx=None, *, row_tile=4096, out_dtype=None,
                 compute_dtype=jnp.float32):
        """coords: [..., bsz, nsmpls, coord_dim] -> [..., bsz, nsmpls, latent_dim]."""
        if self.encode_method == "positional_encoding":
            if out_dtype is None:
                out_dtype = _default_out_dtype()
            lead_shape = coords.shape[:-1]
            coord_dim = coords.shape[-1]
            flat = coords.reshape(-1, coord_dim).astype(jnp.float32)
            # Append the ones column so the bias rides the MXU matmul (K = coord_dim+1).
            ones = jnp.ones((flat.shape[0], 1), dtype=jnp.float32)
            flat_aug = jnp.concatenate([flat, ones], axis=1)
            lat = randgaus_encode(flat_aug, self.W2,
                                  row_tile=row_tile, out_dtype=out_dtype,
                                  compute_dtype=compute_dtype)
            return lat.reshape(*lead_shape, self.pe_dim)
        else:
            # identity fallthrough (matches `latents = coords`)
            return coords


# ---------------------------------- main --------------------------------------

if __name__ == "__main__":
    key = jax.random.PRNGKey(0)
    coord_dim = 3
    pe_dim, omega, sigma = 128, 1.0, 4.0

    enc = Encoder(
        input_dim=coord_dim,
        encode_method="positional_encoding",
        embedder_args=(coord_dim, pe_dim, omega, sigma, True, 0, False),
    )

    def reference(coords):
        flat = coords.reshape(-1, coord_dim)
        z = omega * (flat @ enc.W) + enc.b
        return jnp.concatenate([jnp.sin(z), jnp.cos(z)], axis=-1).reshape(
            *coords.shape[:-1], pe_dim)

    def tol_for(x):
        # bf16 output (auto-selected on v5e) needs a looser tolerance.
        return (2e-2, 2e-2) if x.dtype == jnp.bfloat16 else (1e-5, 1e-5)

    # Case 1: small, tile-aligned (bsz=2, nsmpls=8 -> N=16 rows). Grid collapses to 1.
    k1, k2 = jax.random.split(key)
    coords = jax.random.uniform(k1, (2, 8, coord_dim),
                                dtype=jnp.float32, minval=-1.0, maxval=1.0)
    latents = jax.block_until_ready(enc(coords))
    assert latents.shape == (2, 8, pe_dim), latents.shape
    atol, rtol = tol_for(latents)
    assert jnp.allclose(latents.astype(jnp.float32), reference(coords),
                        atol=atol, rtol=rtol)

    # Case 2: N not a multiple of the row tile; exercises the masked tail tile and
    # the >=2-grid-step clamp (N=60, row_tile=64 -> tile=32, grid=2).
    coords2 = jax.random.uniform(k2, (3, 20, coord_dim),
                                 dtype=jnp.float32, minval=-1.0, maxval=1.0)
    latents2 = jax.block_until_ready(enc(coords2, row_tile=64))
    assert latents2.shape == (3, 20, pe_dim), latents2.shape
    atol, rtol = tol_for(latents2)
    assert jnp.allclose(latents2.astype(jnp.float32), reference(coords2),
                        atol=atol, rtol=rtol)

    # Case 3: explicit f32 output regardless of generation (tight tolerance).
    latents3 = jax.block_until_ready(enc(coords2, out_dtype=jnp.float32))
    assert jnp.allclose(latents3, reference(coords2), atol=1e-5, rtol=1e-5)

    print("KERNEL_OK")
</pallas_src>

<mosaic_0001>
module attributes {stable_mosaic.version = 11 : i64} {
  func.func @_randgaus_kernel(%arg0: i32, %arg1: memref<16x4xf32, #tpu.memory_space<vmem>>, %arg2: memref<4x128xf32, #tpu.memory_space<vmem>>, %arg3: memref<16x128xf32, #tpu.memory_space<vmem>>) attributes {dimension_semantics = [#tpu.dimension_semantics<parallel>], iteration_bounds = array<i64: 1>, scalar_prefetch = 0 : i64, scratch_operands = 0 : i64, tpu.core_type = #tpu.core_type<tc>, window_params = [{transform_indices = @transform_0, window_bounds = array<i64: 16, 4>}, {pipeline_mode = #tpu.pipeline_mode<synchronous>, transform_indices = @transform_1, window_bounds = array<i64: 4, 128>}, {transform_indices = @transform_2, window_bounds = array<i64: 16, 128>}]} {
    %c0 = arith.constant 0 : index
    %c0_0 = arith.constant 0 : index
    %0 = vector.load %arg1[%c0, %c0_0] : memref<16x4xf32, #tpu.memory_space<vmem>>, vector<16x4xf32>
    %c0_1 = arith.constant 0 : index
    %c0_2 = arith.constant 0 : index
    %1 = vector.load %arg2[%c0_1, %c0_2] : memref<4x128xf32, #tpu.memory_space<vmem>>, vector<4x128xf32>
    %cst = arith.constant dense<0.000000e+00> : vector<16x128xf32>
    %2 = tpu.matmul %0, %1, %cst {dimension_numbers = #tpu.dot_dimension_numbers<[1], [0], [0], [1], [0, 0, 1, 1], [], []>} : vector<16x4xf32>, vector<4x128xf32>, vector<16x128xf32> -> vector<16x128xf32>
    %3 = math.sin %2 : vector<16x128xf32>
    %c0_3 = arith.constant 0 : index
    %c0_4 = arith.constant 0 : index
    %4 = vector.load %arg3[%c0_3, %c0_4] : memref<16x128xf32, #tpu.memory_space<vmem>>, vector<16x128xf32>
    tpu.vector_store %arg3[%c0_3, %c0_4], %3 {strides = array<i32>} : memref<16x128xf32, #tpu.memory_space<vmem>>, vector<16x128xf32>,
    return
  }
  func.func @transform_0(%arg0: i32) -> (i32, i32) {
    %c0_i32 = arith.constant 0 : i32
    %c0_i32_0 = arith.constant 0 : i32
    return %arg0, %c0_i32 : i32, i32
  }
  func.func @transform_1(%arg0: i32) -> (i32, i32) {
    %c0_i32 = arith.constant 0 : i32
    %c0_i32_0 = arith.constant 0 : i32
    %c0_i32_1 = arith.constant 0 : i32
    return %c0_i32, %c0_i32_0 : i32, i32
  }
  func.func @transform_2(%arg0: i32) -> (i32, i32) {
    %c0_i32 = arith.constant 0 : i32
    %c0_i32_0 = arith.constant 0 : i32
    return %arg0, %c0_i32 : i32, i32
  }
}

</mosaic_0001>

<bundles_post_ra>
// kernel: tpu_custom_call.1
= control target key start
LH: loop header
LB: loop body
LE: loop exit
PB: predicated region body
PF: predicated region fallthrough
CT: control target
= control target key end

     0   :  { %vm22_vm0 = vcmask 1043456   ;;  %vm15_vm1 = vcmask 31744   ;;  %s502_s0 = inlined_call_operand.vmem [shape: f32[16,4], index: 0, kind: input, shape index: {}]   ;;  %s503_s1 = inlined_call_operand.vmem [shape: f32[4,128], index: 1, kind: input, shape index: {}]   ;;  %s504_s2 = inlined_call_operand.hbm [shape: f32[16,128], index: 2, kind: output, shape index: {}]  }
   0x1   :  { %v14_v0 = vld [vmem:[%s503_s1] sm:$0xf]  ;;  %v13_v2 = vld [vmem:[%s502_s0 + $0x8] sm:$0xff] }
   0x2   :  { %v12_v1 = vld [vmem:[%s502_s0] sm:$0xff]  ;;  %341 = vmatprep.subr.msk.mxu0 %vm22_vm0, %v14_v0 }
   0x3   :  { %343 = vmatprep.mubr.msk.f32.mxu0 %vm15_vm1, %v12_v1 }
   0x4   :  { %7 = vsyncpa [#allocation3], 0  ;;  %342 = vmatpush3.msk.msra.mxu0 %vm22_vm0, %v14_v0  ;;  %v395_v25 = vmov 683565275   ;;  %v396_v29 = vmov 2475754826  }
   0x5   :  { %344 = vmatmul.mubr.msk.f32.vlgmr.msra.gmra.mrb[0].mxu0 %vm15_vm1, %v13_v2  ;;  %v397_v31 = vmov 2131351028   ;;  %v398_v33 = vmov 2102212464   ;;  %v399_v35 = vmov 920167782  }
   0x6   :  { %v400_v42 = vmov 1326507024   ;;  %s401_s0 = smov [#allocation2]  }
   0x7   :  { %s316_s1 = sshll.u32 %s401_s0, 4  ;;  %s317_s1 = int_to_ptr.vmem [resolvable:$true] %s316_s1 }
   0x8   :  { %s371_s15 = scalar_lea.vmem %s317_s1, 256  ;;  %p376_p1 = scmp.lt.s32.totalorder %s317_s1, %s317_s1 }
   0x9   :  { %p372_p0 = scmp.ne.s32.totalorder %s317_s1, %s371_s15  ;;  %p377_p2 = scmp.lt.s32.totalorder %s371_s15, %s371_s15 }
   0xb   :  { %p378_p3 = por %p377_p2, %p376_p1 }
   0xd   :  { %p379_p4 = pnand %p378_p3, %p372_p0 }
  0xd8   :  { %v428_v3 = vpop.f32.mrb[0].mxu0 }
  0xd9   :  { %v205_v4 = vand.u32 2147483647, %v428_v3  ;;  %v208_v5 = vand.u32 2139095040, %v428_v3  ;;  %v432_v6 = vpop.f32.mrb[1].mxu0  ;;  %vm207_vm0 = vcmp.lt.s32.totalorder %v428_v3, 0 }
  0xda   :  { %v104_v7 = vand.u32 2139095040, %v432_v6  ;;  %v101_v10 = vand.u32 2147483647, %v432_v6 }
  0xdb   :  { %v209_v8 = vshrl.u32 %v208_v5, 23  ;;  %v212_v9 = vand.u32 8388607, %v205_v4  ;;  %vm206_vm1 = vcmp.le.f32.partialorder %v205_v4, 0.7853982 }
  0xdc   :  { %v105_v11 = vshrl.u32 %v104_v7, 23  ;;  %v440_v16 = vand.u32 8388607, %v101_v10 }
  0xdd   :  { %v334_v12 = vadd.s32 4294967169, %v209_v8  ;;  %v213_v15 = vor.u32 8388608, %v212_v9 }
  0xde   :  { %v330_v13 = vadd.s32 4294967169, %v105_v11  ;;  %v109_v23 = vor.u32 8388608, %v440_v16 }
  0xdf   :  { %v215_v14 = vadd.s32 1, %v334_v12  ;;  %v442_v22 = vshll.u32 %v213_v15, 8 }
  0xe0   :  { %v111_v17 = vadd.s32 1, %v330_v13 }
  0xe1   :  { %vm216_vm2 = vcmp.gt.s32.totalorder %v215_v14, 0 }
  0xe2   :  { %v217_v18 = vsel %vm216_vm2, %v215_v14, 0  ;;  %vm112_vm3 = vcmp.gt.s32.totalorder %v111_v17, 0  ;;  %vm103_vm2 = vcmp.lt.s32.totalorder %v432_v6, 0 }
  0xe3   :  { %v218_v19 = vshrl.u32 %v217_v18, 5  ;;  %v219_v20 = vand.u32 31, %v217_v18  ;;  %v113_v21 = vsel %vm112_vm3, %v111_v17, 0  ;;  %v149_v17 = vshll.u32 %v109_v23, 8 }
  0xe4   :  { %v445_v27 = vshrl.u32 %v113_v21, 5  ;;  %v115_v28 = vand.u32 31, %v113_v21  ;;  %vm102_vm3 = vcmp.le.f32.partialorder %v101_v10, 0.7853982 }
  0xe5   :  { %v220_v24 = vsub.s32 32, %v219_v20  ;;  %v222_v26 = vshll.u32 %v395_v25, %v219_v20  ;;  %v225_v30 = vshll.u32 %v396_v29, %v219_v20  ;;  %v228_v32 = vshll.u32 %v397_v31, %v219_v20 }
  0xe6   :  { %v231_v34 = vshll.u32 %v398_v33, %v219_v20  ;;  %v234_v36 = vshll.u32 %v399_v35, %v219_v20  ;;  %vm237_vm4 = vcmp.lt.s32.totalorder %v218_v19, 1  ;;  %vm238_vm5 = vcmp.lt.s32.totalorder %v218_v19, 2 }
  0xe7   :  { %v223_v37 = vshrl.u32 %v396_v29, %v220_v24  ;;  %v226_v38 = vshrl.u32 %v397_v31, %v220_v24  ;;  %v229_v39 = vshrl.u32 %v398_v33, %v220_v24  ;;  %v221_v40 = vshrl.u32 %v395_v25, %v220_v24 }
  0xe8   :  { %v232_v41 = vshrl.u32 %v399_v35, %v220_v24  ;;  %v235_v43 = vshrl.u32 %v400_v42, %v220_v24  ;;  %v116_v47 = vsub.s32 32, %v115_v28  ;;  %vm239_vm6 = vcmp.lt.s32.totalorder %v218_v19, 3 }
  0xe9   :  { %v224_v44 = vor.u32 %v223_v37, %v222_v26  ;;  %v227_v45 = vor.u32 %v226_v38, %v225_v30  ;;  %v230_v46 = vor.u32 %v229_v39, %v228_v32  ;;  %vm240_vm7 = vcmp.lt.s32.totalorder %v218_v19, 4 }
  0xea   :  { %v233_v48 = vor.u32 %v232_v41, %v231_v34  ;;  %v236_v49 = vor.u32 %v235_v43, %v234_v36  ;;  %v118_v57 = vshll.u32 %v395_v25, %v115_v28  ;;  %v119_v60 = vshrl.u32 %v396_v29, %v116_v47 }
  0xeb   :  { %v241_v50 = vsel %vm237_vm4, %v221_v40, %v224_v44  ;;  %v242_v51 = vsel %vm240_vm7, %v230_v46, 2102212464  ;;  %v245_v52 = vsel %vm237_vm4, %v224_v44, %v227_v45  ;;  %v249_v53 = vsel %vm237_vm4, %v227_v45, %v230_v46 }
  0xec   :  { %v243_v54 = vsel %vm239_vm6, %v227_v45, %v242_v51  ;;  %v246_v55 = vsel %vm240_vm7, %v233_v48, 920167782  ;;  %v250_v56 = vsel %vm240_vm7, %v236_v49, 1326507024  ;;  %v121_v61 = vshll.u32 %v396_v29, %v115_v28 }
  0xed   :  { %v247_v58 = vsel %vm239_vm6, %v230_v46, %v246_v55  ;;  %v251_v59 = vsel %vm239_vm6, %v233_v48, %v250_v56  ;;  %v244_v62 = vsel %vm238_vm5, %v241_v50, %v243_v54  ;;  %v122_v1 = vshrl.u32 %v397_v31, %v116_v47 }
  0xee   :  { %v248_v63 = vsel %vm238_vm5, %v245_v52, %v247_v58  ;;  %v252_v0 = vsel %vm238_vm5, %v249_v53, %v251_v59  ;;  %v120_v9 = vor.u32 %v119_v60, %v118_v57  ;;  %v124_v12 = vshll.u32 %v397_v31, %v115_v28 }
  0xef   :  { %v454_v2 = vmul.u32.u64.low %v442_v22, %v252_v0  ;;  %v455_v5 = vmul.u32.u64.high %v442_v22, %v252_v0, %v454_v2  ;;  %v458_v7 = vmul.u32.u64.low %v442_v22, %v248_v63  ;;  %v459_v8 = vmul.u32.u64.high %v442_v22, %v248_v63, %v458_v7 }
  0xf0   :  { %v123_v11 = vor.u32 %v122_v1, %v121_v61  ;;  %v125_v13 = vshrl.u32 %v398_v33, %v116_v47  ;;  %v127_v14 = vshll.u32 %v398_v33, %v115_v28  ;;  %v128_v15 = vshrl.u32 %v399_v35, %v116_v47 }
  0xf1   :  { %v131_v16 = vshrl.u32 %v400_v42, %v116_v47  ;;  %v260_v18 = vmul.u32 %v442_v22, %v244_v62  ;;  %v117_v19 = vshrl.u32 %v395_v25, %v116_v47  ;;  %v130_v21 = vshll.u32 %v399_v35, %v115_v28 }
  0xf2   :  { %v126_v20 = vor.u32 %v125_v13, %v124_v12  ;;  %vm262_vm8 = vc.u32 %v455_v5, %v458_v7  ;;  %v263_v24 = vadd.s32 1, %v459_v8  ;;  %v129_v26 = vor.u32 %v128_v15, %v127_v14 }
  0xf3   :  { %vm133_vm9 = vcmp.lt.s32.totalorder %v445_v27, 1  ;;  %v132_v29 = vor.u32 %v131_v16, %v130_v21  ;;  %vm135_vm10 = vcmp.lt.s32.totalorder %v445_v27, 3  ;;  %vm136_vm11 = vcmp.lt.s32.totalorder %v445_v27, 4 }
  0xf4   :  { %v141_v30 = vsel %vm133_vm9, %v120_v9, %v123_v11  ;;  %v264_v23 = vsel %vm262_vm8, %v263_v24, %v459_v8  ;;  %v138_v31 = vsel %vm136_vm11, %v126_v20, 2102212464  ;;  %v142_v22 = vsel %vm136_vm11, %v129_v26, 920167782 }
  0xf5   :  { %v145_v25 = vsel %vm133_vm9, %v123_v11, %v126_v20  ;;  %v265_v32 = vadd.s32 %v264_v23, %v260_v18  ;;  %vm134_vm12 = vcmp.lt.s32.totalorder %v445_v27, 2  ;;  %v143_v28 = vsel %vm135_vm10, %v126_v20, %v142_v22 }
  0xf6   :  { %v146_v33 = vsel %vm136_vm11, %v132_v29, 1326507024  ;;  %v137_v34 = vsel %vm133_vm9, %v117_v19, %v120_v9  ;;  %v139_v35 = vsel %vm135_vm10, %v123_v11, %v138_v31  ;;  %v144_v36 = vsel %vm134_vm12, %v141_v30, %v143_v28 }
  0xf7   :  { %v147_v37 = vsel %vm135_vm10, %v129_v26, %v146_v33  ;;  %v266_v38 = vadd.s32 536870912, %v265_v32  ;;  %v469_v40 = vmul.u32.u64.low %v149_v17, %v144_v36  ;;  %v470_v41 = vmul.u32.u64.high %v149_v17, %v144_v36, %v469_v40 }
  0xf8   :  { %v148_v39 = vsel %vm134_vm12, %v145_v25, %v147_v37  ;;  %v140_v45 = vsel %vm134_vm12, %v137_v34, %v139_v35  ;;  %v261_v61 = vadd.s32 %v458_v7, %v455_v5  ;;  %vm297_vm7 = vweird.f32 %v428_v3 }
  0xf9   :  { %v472_v42 = vmul.u32.u64.low %v149_v17, %v148_v39  ;;  %v473_v43 = vmul.u32.u64.high %v149_v17, %v148_v39, %v472_v42  ;;  %v267_v44 = vshrl.u32 %v266_v38, 30  ;;  %v159_v47 = vadd.s32 1, %v470_v41 }
  0xfa   :  { %v156_v27 = vmul.u32 %v149_v17, %v140_v45  ;;  %vm193_vm11 = vweird.f32 %v432_v6 }
  0xfb   :  { %v268_v46 = vshll.u32 %v267_v44, 30  ;;  %vm158_vm13 = vc.u32 %v473_v43, %v469_v40  ;;  %v157_v18 = vadd.s32 %v469_v40, %v473_v43  ;;  %v291_v7 = vsub.s32 4, %v267_v44 }
  0xfc   :  { %v160_v49 = vsel %vm158_vm13, %v159_v47, %v470_v41 }
  0xfd   :  { %v269_v48 = vsub.s32 %v265_v32, %v268_v46  ;;  %v161_v50 = vadd.s32 %v160_v49, %v156_v27  ;;  %v292_v22 = vsel %vm207_vm0, %v291_v7, %v267_v44 }
  0xfe   :  { %v294_v28 = vsel %vm206_vm1, 0, %v292_v22 }
  0xff   :  { %v271_v51 = vsub.s32 0, %v269_v48  ;;  %v162_v52 = vadd.s32 536870912, %v161_v50  ;;  %v298_v37 = vadd.s32 3, %v294_v28 }
 0x101   :  { %v335_v53 = vmin.u32 %v271_v51, %v269_v48  ;;  %v163_v54 = vshrl.u32 %v162_v52, 30  ;;  %v299_v40 = vand.u32 3, %v298_v37 }
 0x103   :  { %v273_v55 = vclz %v335_v53  ;;  %v164_v56 = vshll.u32 %v163_v54, 30  ;;  %v187_v36 = vsub.s32 4, %v163_v54  ;;  %vm304_vm4 = vcmp.eq.s32.totalorder %v299_v40, 2 }
 0x104   :  { %vm301_vm5 = vcmp.eq.s32.totalorder %v299_v40, 0  ;;  %vm300_vm6 = vcmp.lt.s32.totalorder %v299_v40, 2 }
 0x105   :  { %v336_v57 = vadd.s32 4294967294, %v273_v55  ;;  %v165_v58 = vsub.s32 %v161_v50, %v164_v56  ;;  %v188_v39 = vsel %vm103_vm2, %v187_v36, %v163_v54 }
 0x106   :  { %v190_v43 = vsel %vm102_vm3, 0, %v188_v39 }
 0x107   :  { %vm337_vm14 = vcmp.lt.s32.totalorder %v336_v57, 0  ;;  %v167_v60 = vsub.s32 0, %v165_v58  ;;  %v194_v47 = vadd.s32 3, %v190_v43 }
 0x108   :  { %v276_v59 = vsel %vm337_vm14, 0, %v336_v57 }
 0x109   :  { %v277_v62 = vsub.s32 32, %v276_v59  ;;  %v281_v63 = vsub.s32 4294967266, %v276_v59  ;;  %v331_v0 = vmin.u32 %v167_v60, %v165_v58  ;;  %v278_v1 = vshll.u32 %v269_v48, %v276_v59 }
 0x10a   :  { %v195_v50 = vand.u32 3, %v194_v47 }
 0x10b   :  { %v279_v2 = vshrl.u32 %v261_v61, %v277_v62  ;;  %v282_v8 = vadd.s32 127, %v281_v63  ;;  %v169_v9 = vclz %v331_v0 }
 0x10c   :  { %vm200_vm8 = vcmp.eq.s32.totalorder %v195_v50, 2  ;;  %vm197_vm9 = vcmp.eq.s32.totalorder %v195_v50, 0  ;;  %vm196_vm10 = vcmp.lt.s32.totalorder %v195_v50, 2 }
 0x10d   :  { %v280_v11 = vor.u32 %v279_v2, %v278_v1  ;;  %v283_v12 = vshll.u32 %v282_v8, 23  ;;  %v332_v13 = vadd.s32 4294967294, %v169_v9 }
 0x10f   :  { %v284_v14 = vor.u32 4788187, %v283_v12  ;;  %vm333_vm15 = vcmp.lt.s32.totalorder %v332_v13, 0  ;;  %v287_v16 = vcvt.s32.f32 %v280_v11 }
 0x110   :  { %v172_v17 = vsel %vm333_vm15, 0, %v332_v13 }
 0x111   :  { %v285_v15 = vand.u32 2147483647, %v284_v14  ;;  %v173_v19 = vsub.s32 32, %v172_v17  ;;  %v177_v20 = vsub.s32 4294967266, %v172_v17  ;;  %v174_v21 = vshll.u32 %v165_v58, %v172_v17 }
 0x113   :  { %v288_v5 = vmul.f32 %v287_v16, %v285_v15  ;;  %v175_v24 = vshrl.u32 %v157_v18, %v173_v19  ;;  %v178_v26 = vadd.s32 127, %v177_v20 }
 0x115   :  { %v289_v29 = vxor.u32 2147483648, %v288_v5  ;;  %v176_v30 = vor.u32 %v175_v24, %v174_v21  ;;  %v179_v23 = vshll.u32 %v178_v26, 23 }
 0x117   :  { %v290_v31 = vsel %vm207_vm0, %v289_v29, %v288_v5  ;;  %v180_v32 = vor.u32 4788187, %v179_v23  ;;  %v183_v34 = vcvt.s32.f32 %v176_v30 }
 0x118   :  { %v293_v25 = vsel %vm206_vm1, %v428_v3, %v290_v31 }
 0x119   :  { %363 = vcosq.f32 %v293_v25  ;;  %v181_v33 = vand.u32 2147483647, %v180_v32 }
 0x11a   :  { %365 = vsinq.f32 %v293_v25 }
 0x11b   :  { %v184_v35 = vmul.f32 %v183_v34, %v181_v33 }
 0x11d   :  { %v185_v38 = vxor.u32 2147483648, %v184_v35 }
 0x11f   :  { %v186_v4 = vsel %vm103_vm2, %v185_v38, %v184_v35 }
 0x120   :  { %v189_v41 = vsel %vm102_vm3, %v432_v6, %v186_v4 }
 0x121   :  { %367 = vcosq.f32 %v189_v41 }
 0x122   :  { %369 = vsinq.f32 %v189_v41 }
 0x123   :  { %v364_v42 = vpop.eup %363 }
 0x124   :  { %v366_v44 = vpop.eup %365  ;;  %v305_v45 = vxor.u32 2147483648, %v364_v42 }
 0x125   :  { %v302_v46 = vxor.u32 2147483648, %v366_v44 }
 0x126   :  { %v306_v27 = vsel %vm304_vm4, %v305_v45, %v366_v44 }
 0x127   :  { %v303_v48 = vsel %vm301_vm5, %v364_v42, %v302_v46 }
 0x128   :  { %v307_v10 = vsel %vm300_vm6, %v303_v48, %v306_v27 }
 0x129   :  { %v308_v49 = vsel %vm297_vm7, nan, %v307_v10 }
 0x12a   :  { %310 = vst [vmem:[#allocation2 + $0x8] sm:$0xff] %v308_v49 }
 0x12b   :  { %v368_v51 = vpop.eup %367 }
 0x12c   :  { %v370_v52 = vpop.eup %369  ;;  %v201_v53 = vxor.u32 2147483648, %v368_v51 }
 0x12d   :  { %v198_v54 = vxor.u32 2147483648, %v370_v52 }
 0x12e   :  { %v202_v55 = vsel %vm200_vm8, %v201_v53, %v370_v52 }
 0x12f   :  { %v199_v56 = vsel %vm197_vm9, %v368_v51, %v198_v54 }
 0x130   :  { %v203_v57 = vsel %vm196_vm10, %v199_v56, %v202_v55 }
 0x131   :  { %v204_v3 = vsel %vm193_vm11, nan, %v203_v57 }
 0x132   :  { %309 = vst [vmem:[#allocation2] sm:$0xff] %v204_v3 }
 0x133   :  { %382 = shalt.err (!%p379_p4)
}
 0x134   :  { %s383_s18 = scalar_lea.hbm %s504_s2, 256 }
 0x135   :  { %p384_p5 = scmp.ne.s32.totalorder %s504_s2, %s383_s18  ;;  %p387_p6 = scmp.lt.u32.totalorder %s383_s18, %s504_s2 }
 0x137   :  { %p389_p7 = pnand %p387_p6, %p384_p5 }
 0x139   :  { %392 = shalt.err (!%p389_p7)
}
 0x13a   :  { %s402_s23 = smov 128   ;;  %s403_s24 = smov 8  }
 0x13b   :  { %322 = dma.vmem_to_hbm [thread:$0]  %s317_s1, 256, %s504_s2, [#allocation3], %s402_s23, %s402_s23, %s403_s24  }
 0x13c   :  { %393 = dma.done.wait [#allocation3], 256  }
 0x13d   :  { %394 = vsyncadd [#allocation3], 4294967040 }
 0x13e   :  { %326 = vsyncpa [#allocation3], 1 }

</bundles_post_ra>
